<compile_context>
chip_gen: v7x
topology: tpu7x:2x2x1
jax: 0.10.0
libtpu: 0.0.40
codegen_flags: <defaults>
</compile_context>

<pallas_src>
import math
import functools

import jax
import jax.numpy as jnp
from jax.experimental import pallas as pl
from jax.experimental.pallas import tpu as pltpu


LANE = 128
_PE_PERIOD = 50 * 8      # flattened PE repeats every 400 elements (forward hardcodes view(1,50,8))
_BASE_ROWS = 200         # lcm(8 sublanes, 25 rows of one PE period) -> block-alignment unit
_TARGET_ROWS = 2000      # ~1 MiB per f32 block: big enough to sit near the HBM roofline


# ---------------------------------------------------------------------------
# Parameter / buffer setup (plain JAX glue, mirrors PositionalEncoding.__init__)
# ---------------------------------------------------------------------------
def make_positional_encoding_table(max_len: int, d_model: int) -> jnp.ndarray:
    position = jnp.arange(0, max_len, dtype=jnp.float32)[:, None]            # (max_len, 1)
    div_term = jnp.exp(
        jnp.arange(0, d_model, 2, dtype=jnp.float32) * (-math.log(10000.0) / d_model)
    )                                                                         # (d_model//2,)
    angles = position * div_term                                              # (max_len, d_model//2)
    pe = jnp.zeros((max_len, d_model), dtype=jnp.float32)
    pe = pe.at[:, 0::2].set(jnp.sin(angles))
    pe = pe.at[:, 1::2].set(jnp.cos(angles))
    return pe


# ---------------------------------------------------------------------------
# Pallas kernel: lane-dense fused  out = dropout(x + pe)
# ---------------------------------------------------------------------------
def _pe_add_dropout_kernel(x_ref, pe_ref, bits_ref, o_ref, *, threshold, scale):
    # All refs are (blk_rows, 128): full 128-lane utilization, unmasked stores.
    y = x_ref[...].astype(jnp.float32) + pe_ref[...]          # pe is resident f32 tile
    keep = bits_ref[...] >= jnp.uint32(threshold)             # P(keep) = 1 - p
    y = jnp.where(keep, y * jnp.float32(scale), 0.0)
    o_ref[...] = y.astype(o_ref.dtype)


def _choose_block_rows(rows_needed: int) -> int:
    blocks_of_base = -(-rows_needed // _BASE_ROWS)
    return _BASE_ROWS * max(1, min(blocks_of_base, _TARGET_ROWS // _BASE_ROWS))


# ---------------------------------------------------------------------------
# Wrapper (the "module")
# ---------------------------------------------------------------------------
class PositionalEncoding:
    def __init__(self, d_model: int, max_len: int = 5000, dropout: float = 0.1):
        self.d_model = d_model
        self.max_len = max_len
        self.p = float(dropout)
        self.pe = make_positional_encoding_table(max_len, d_model)   # (max_len, d_model) f32
        self._pe_block_cache = {}                                     # blk_rows -> (blk_rows,128) f32

    def _pe_block(self, blk_rows: int) -> jnp.ndarray:
        cached = self._pe_block_cache.get(blk_rows)
        if cached is None:
            pe_flat = self.pe[:50, :].reshape(-1)                     # (400,) f32
            reps = (blk_rows * LANE) // _PE_PERIOD                    # exact: blk_rows % 25 == 0
            cached = jnp.tile(pe_flat, reps).reshape(blk_rows, LANE)
            self._pe_block_cache[blk_rows] = cached
        return cached

    def __call__(self, x: jnp.ndarray, *, training: bool = False, rng_key=None):
        B, S, D = x.shape
        assert D == self.d_model
        # The PyTorch forward hardcodes .view(1, 50, 8) -> seq_len=50, d_model=8.
        assert (S, D) == (50, 8), "forward() hardcodes view(1, 50, 8)"

        # Eval path (dropout is identity): one trivially-fusible elementwise add.
        # Per perf review, a standalone pallas_call here is pure overhead; let XLA fuse it.
        if (not training) or self.p == 0.0 and not training:
            return x + self.pe[:S, :][None, :, :]

        if self.p >= 1.0:          # torch nn.Dropout(p=1) zeroes everything
            return jnp.zeros_like(x)

        if rng_key is None:
            rng_key = jax.random.PRNGKey(0)

        # ---- lane-dense training path ----
        N = B * S * D
        rows_needed = -(-N // LANE)
        blk_rows = _choose_block_rows(rows_needed)
        n_blocks = -(-rows_needed // blk_rows)
        padded_rows = n_blocks * blk_rows
        pad = padded_rows * LANE - N

        x_slab = jnp.pad(x.reshape(-1), (0, pad)).reshape(padded_rows, LANE)
        pe_block = self._pe_block(blk_rows)                            # (blk_rows,128) f32, cached
        bits = jax.random.bits(rng_key, (padded_rows, LANE), dtype=jnp.uint32)

        threshold = min(int(round(self.p * (2.0 ** 32))), 2 ** 32 - 1)
        scale = 1.0 / (1.0 - self.p)

        out_slab = pl.pallas_call(
            functools.partial(_pe_add_dropout_kernel, threshold=threshold, scale=scale),
            out_shape=jax.ShapeDtypeStruct((padded_rows, LANE), x.dtype),
            grid=(n_blocks,),
            in_specs=[
                pl.BlockSpec((blk_rows, LANE), lambda i: (i, 0)),      # x slab (pipelined)
                pl.BlockSpec((blk_rows, LANE), lambda i: (0, 0)),      # PE tile, VMEM-resident
                pl.BlockSpec((blk_rows, LANE), lambda i: (i, 0)),      # random bits (pipelined)
            ],
            out_specs=pl.BlockSpec((blk_rows, LANE), lambda i: (i, 0)),
            compiler_params=pltpu.CompilerParams(
                dimension_semantics=("parallel",)),                    # shard rows across TCs (v7x)
        )(x_slab, pe_block, bits)

        return out_slab.reshape(-1)[:N].reshape(B, S, D)


# ---------------------------------------------------------------------------
# Demo / self-check
# ---------------------------------------------------------------------------
if __name__ == "__main__":
    key = jax.random.PRNGKey(0)
    kx, kd = jax.random.split(key)
    B, S, D = 2, 50, 8   # seq_len=50 and d_model=8 are forced by the module's forward()
    x = jax.random.normal(kx, (B, S, D), dtype=jnp.float32)

    module = PositionalEncoding(d_model=D, max_len=5000, dropout=0.1)
    ref = x + module.pe[:S, :][None, :, :]

    # eval-mode forward (dropout identity, plain JAX per perf review)
    y_eval = module(x, training=False)
    jax.block_until_ready(y_eval)
    assert jnp.allclose(y_eval, ref, atol=1e-6), "mismatch vs reference add (eval)"

    # training-mode forward with p=0 exercises the full Pallas path
    # (pad -> lane-dense slab -> PE add -> mask/select -> unpad) exactly.
    module_p0 = PositionalEncoding(d_model=D, max_len=5000, dropout=0.0)
    y_p0 = module_p0(x, training=True, rng_key=kd)
    jax.block_until_ready(y_p0)
    assert jnp.allclose(y_p0, ref, atol=1e-6), "Pallas add path mismatch"

    # training-mode forward with dropout: each element is either 0 or (x+pe)/(1-p)
    y_train = module(x, training=True, rng_key=kd)
    jax.block_until_ready(y_train)
    assert y_train.shape == (B, S, D)
    scaled = ref / (1.0 - module.p)
    ok = jnp.isclose(y_train, scaled, atol=1e-5) | (y_train == 0.0)
    assert bool(jnp.all(ok)), "dropout output not {0, scaled} valued"

    print("KERNEL_OK")
</pallas_src>

<mosaic_0001>
module attributes {stable_mosaic.version = 11 : i64} {
  func.func @_pe_add_dropout_kernel(%arg0: i32, %arg1: memref<200x128xf32, #tpu.memory_space<vmem>>, %arg2: memref<200x128xf32, #tpu.memory_space<vmem>>, %arg3: memref<200x128xi32, #tpu.memory_space<vmem>>, %arg4: memref<200x128xf32, #tpu.memory_space<vmem>>) attributes {dimension_semantics = [#tpu.dimension_semantics<parallel>], iteration_bounds = array<i64: 1>, scalar_prefetch = 0 : i64, scratch_operands = 0 : i64, tpu.core_type = #tpu.core_type<tc>, window_params = [{transform_indices = @transform_0, window_bounds = array<i64: 200, 128>}, {pipeline_mode = #tpu.pipeline_mode<synchronous>, transform_indices = @transform_1, window_bounds = array<i64: 200, 128>}, {transform_indices = @transform_2, window_bounds = array<i64: 200, 128>}, {transform_indices = @transform_3, window_bounds = array<i64: 200, 128>}]} {
    %c0 = arith.constant 0 : index
    %c0_0 = arith.constant 0 : index
    %0 = vector.load %arg1[%c0, %c0_0] : memref<200x128xf32, #tpu.memory_space<vmem>>, vector<200x128xf32>
    %c0_1 = arith.constant 0 : index
    %c0_2 = arith.constant 0 : index
    %1 = vector.load %arg2[%c0_1, %c0_2] : memref<200x128xf32, #tpu.memory_space<vmem>>, vector<200x128xf32>
    %2 = arith.addf %0, %1 : vector<200x128xf32>
    %c0_3 = arith.constant 0 : index
    %c0_4 = arith.constant 0 : index
    %3 = vector.load %arg3[%c0_3, %c0_4] : memref<200x128xi32, #tpu.memory_space<vmem>>, vector<200x128xi32>
    %c0_i32 = arith.constant 0 : i32
    %4 = vector.broadcast %c0_i32 : i32 to vector<200x128xi32>
    %5 = arith.cmpi uge, %3, %4 : vector<200x128xi32>
    %cst = arith.constant 1.000000e+00 : f32
    %6 = vector.broadcast %cst : f32 to vector<200x128xf32>
    %7 = arith.mulf %2, %6 : vector<200x128xf32>
    %cst_5 = arith.constant 0.000000e+00 : f32
    %8 = vector.broadcast %cst_5 : f32 to vector<200x128xf32>
    %9 = arith.select %5, %7, %8 : vector<200x128xi1>, vector<200x128xf32>
    %c0_6 = arith.constant 0 : index
    %c0_7 = arith.constant 0 : index
    %10 = vector.load %arg4[%c0_6, %c0_7] : memref<200x128xf32, #tpu.memory_space<vmem>>, vector<200x128xf32>
    tpu.vector_store %arg4[%c0_6, %c0_7], %9 {strides = array<i32>} : memref<200x128xf32, #tpu.memory_space<vmem>>, vector<200x128xf32>,
    return
  }
  func.func @transform_0(%arg0: i32) -> (i32, i32) {
    %c0_i32 = arith.constant 0 : i32
    %c0_i32_0 = arith.constant 0 : i32
    return %arg0, %c0_i32 : i32, i32
  }
  func.func @transform_1(%arg0: i32) -> (i32, i32) {
    %c0_i32 = arith.constant 0 : i32
    %c0_i32_0 = arith.constant 0 : i32
    %c0_i32_1 = arith.constant 0 : i32
    return %c0_i32, %c0_i32_0 : i32, i32
  }
  func.func @transform_2(%arg0: i32) -> (i32, i32) {
    %c0_i32 = arith.constant 0 : i32
    %c0_i32_0 = arith.constant 0 : i32
    return %arg0, %c0_i32 : i32, i32
  }
  func.func @transform_3(%arg0: i32) -> (i32, i32) {
    %c0_i32 = arith.constant 0 : i32
    %c0_i32_0 = arith.constant 0 : i32
    return %arg0, %c0_i32 : i32, i32
  }
}

</mosaic_0001>

<bundles_post_ra>
// kernel: tpu_custom_call.1
= control target key start
LH: loop header
LB: loop body
LE: loop exit
PB: predicated region body
PF: predicated region fallthrough
CT: control target
= control target key end

     0   :  { %8 = vsyncpa [#allocation3], 0  ;;  %s442_s0 = inlined_call_operand.hbm [shape: f32[200,128], index: 0, kind: input, shape index: {}]   ;;  %s443_s1 = inlined_call_operand.hbm [shape: f32[200,128], index: 1, kind: input, shape index: {}]   ;;  %s444_s2 = inlined_call_operand.hbm [shape: u32[200,128], index: 2, kind: input, shape index: {}]   ;;  %s445_s3 = inlined_call_operand.hbm [shape: f32[200,128], index: 3, kind: output, shape index: {}]  }
   0x1   :  { %9 = vsyncpa [#allocation6], 0 }
   0x2   :  { %10 = vsyncpa [#allocation4], 0  ;;  %s349_s12 = smov [#allocation5]   ;;  %s350_s14 = smov [#allocation2]  }
   0x3   :  { %s28_s13 = sshll.u32 %s349_s12, 4  ;;  %s16_s15 = sshll.u32 %s350_s14, 4  ;;  %s29_s13 = int_to_ptr.vmem [resolvable:$true] %s28_s13  ;;  %s375_s15 = int_to_ptr.vmem [resolvable:$true] %s16_s15 }
   0x4   :  { %s255_s18 = scalar_lea.hbm %s443_s1, 3200 }
   0x5   :  { %p256_p0 = scmp.ne.s32.totalorder %s443_s1, %s255_s18  ;;  %p259_p1 = scmp.lt.u32.totalorder %s255_s18, %s443_s1 }
   0x7   :  { %p261_p2 = pnand %p259_p1, %p256_p0 }
   0x9   :  { %264 = shalt.err (!%p261_p2)
}
   0xa   :  { %s265_s23 = scalar_lea.vmem %s29_s13, 3200  ;;  %p270_p4 = scmp.lt.s32.totalorder %s29_s13, %s29_s13 }
   0xb   :  { %p266_p3 = scmp.ne.s32.totalorder %s29_s13, %s265_s23  ;;  %p271_p5 = scmp.lt.s32.totalorder %s265_s23, %s265_s23 }
   0xd   :  { %p272_p6 = por %p271_p5, %p270_p4 }
   0xf   :  { %p273_p7 = pnand %p272_p6, %p266_p3 }
  0x11   :  { %276 = shalt.err (!%p273_p7)
}
  0x12   :  { %s351_s24 = smov 128   ;;  %s352_s25 = smov 8  }
  0x13   :  { %34 = dma.hbm_to_vmem [thread:$0]  %s443_s1, 3200, %s29_s13, [#allocation6], %s351_s24, %s351_s24, %s352_s25  }
  0x14   :  { %s277_s30 = scalar_lea.hbm %s442_s0, 3200 }
  0x15   :  { %p278_p8 = scmp.ne.s32.totalorder %s442_s0, %s277_s30  ;;  %p281_p9 = scmp.lt.u32.totalorder %s277_s30, %s442_s0 }
  0x17   :  { %p283_p10 = pnand %p281_p9, %p278_p8 }
  0x19   :  { %286 = shalt.err (!%p283_p10)
}
  0x1a   :  { %s287_s8 = scalar_lea.vmem %s375_s15, 3200  ;;  %p292_p12 = scmp.lt.s32.totalorder %s375_s15, %s375_s15 }
  0x1b   :  { %p288_p11 = scmp.ne.s32.totalorder %s375_s15, %s287_s8  ;;  %p293_p13 = scmp.lt.s32.totalorder %s287_s8, %s287_s8 }
  0x1d   :  { %p294_p0 = por %p293_p13, %p292_p12 }
  0x1f   :  { %p295_p1 = pnand %p294_p0, %p288_p11 }
  0x21   :  { %298 = shalt.err (!%p295_p1)
}
  0x22   :  { %22 = dma.hbm_to_vmem [thread:$0]  %s442_s0, 3200, %s375_s15, [#allocation3], %s351_s24, %s351_s24, %s352_s25  }
  0x23   :  { %s353_s10 = smov [#allocation7]   ;;  %s299_s14 = scalar_lea.hbm %s444_s2, 3200 }
  0x24   :  { %s40_s11 = sshll.u32 %s353_s10, 4  ;;  %p300_p2 = scmp.ne.s32.totalorder %s444_s2, %s299_s14  ;;  %s41_s11 = int_to_ptr.vmem [resolvable:$true] %s40_s11 }
  0x25   :  { %p303_p3 = scmp.lt.u32.totalorder %s299_s14, %s444_s2 }
  0x27   :  { %p305_p4 = pnand %p303_p3, %p300_p2 }
  0x29   :  { %308 = shalt.err (!%p305_p4)
}
  0x2a   :  { %s309_s20 = scalar_lea.vmem %s41_s11, 3200  ;;  %p314_p6 = scmp.lt.s32.totalorder %s41_s11, %s41_s11 }
  0x2b   :  { %p310_p5 = scmp.ne.s32.totalorder %s41_s11, %s309_s20  ;;  %p315_p7 = scmp.lt.s32.totalorder %s309_s20, %s309_s20 }
  0x2d   :  { %p316_p8 = por %p315_p7, %p314_p6 }
  0x2f   :  { %p317_p9 = pnand %p316_p8, %p310_p5 }
  0x31   :  { %320 = shalt.err (!%p317_p9)
}
  0x32   :  { %46 = dma.hbm_to_vmem [thread:$0]  %s444_s2, 3200, %s41_s11, [#allocation6], %s351_s24, %s351_s24, %s352_s25  }
  0x33   :  { %343 = dma.done.wait [#allocation3], 3200  }
  0x34   :  { %344 = vsyncadd [#allocation3], 4294964096 }
  0x35   :  { %345 = dma.done.wait [#allocation6], 6400  }
  0x36   :  { %346 = vsyncadd [#allocation6], 4294960896  ;;  %v56_v0 = vld [vmem:[#allocation2] sm:$0xff]  ;;  %v81_v1 = vld [vmem:[#allocation5] sm:$0xff]  ;;  %s354_s2 = smov [#allocation8]  }
  0x37   :  { %v131_v2 = vld [vmem:[#allocation7] sm:$0xff]  ;;  %v106_v3 = vadd.f32 %v81_v1, %v56_v0  ;;  %v57_v4 = vld [vmem:[#allocation2 + $0x8] sm:$0xff]  ;;  %v132_v6 = vld [vmem:[#allocation7 + $0x8] sm:$0xff]  ;;  %s236_s21 = sshll.u32 %s354_s2, 4  ;;  %s237_s21 = int_to_ptr.vmem [resolvable:$true] %s236_s21 }
  0x38   :  { %vm156_vm0 = vcmp.ge.u32.totalorder %v131_v2, 0  ;;  %v82_v5 = vld [vmem:[#allocation5 + $0x8] sm:$0xff]  ;;  %vm157_vm1 = vcmp.ge.u32.totalorder %v132_v6, 0  ;;  %v83_v9 = vld [vmem:[#allocation5 + $0x10] sm:$0xff]  ;;  %v133_v10 = vld [vmem:[#allocation7 + $0x10] sm:$0xff]  ;;  %s321_s22 = scalar_lea.vmem %s237_s21, 3200  ;;  %p326_p11 = scmp.lt.s32.totalorder %s237_s21, %s237_s21 }
  0x39   :  { %v107_v7 = vadd.f32 %v82_v5, %v57_v4  ;;  %v58_v8 = vld [vmem:[#allocation2 + $0x10] sm:$0xff]  ;;  %v181_v11 = vsel %vm156_vm0, %v106_v3, 0.0  ;;  %vm158_vm2 = vcmp.ge.u32.totalorder %v133_v10, 0  ;;  %v59_v13 = vld [vmem:[#allocation2 + $0x18] sm:$0xff]  ;;  %v84_v14 = vld [vmem:[#allocation5 + $0x18] sm:$0xff]  ;;  %p322_p10 = scmp.ne.s32.totalorder %s237_s21, %s321_s22  ;;  %p327_p12 = scmp.lt.s32.totalorder %s321_s22, %s321_s22 }
  0x3a   :  { %v108_v12 = vadd.f32 %v83_v9, %v58_v8  ;;  %v134_v15 = vld [vmem:[#allocation7 + $0x18] sm:$0xff]  ;;  %206 = vst [vmem:[#allocation8] sm:$0xff] %v181_v11  ;;  %v109_v17 = vadd.f32 %v84_v14, %v59_v13  ;;  %v60_v18 = vld [vmem:[#allocation2 + $0x20] sm:$0xff]  ;;  %v135_v20 = vld [vmem:[#allocation7 + $0x20] sm:$0xff] }
  0x3b   :  { %v182_v16 = vsel %vm157_vm1, %v107_v7, 0.0  ;;  %vm159_vm3 = vcmp.ge.u32.totalorder %v134_v15, 0  ;;  %v85_v19 = vld [vmem:[#allocation5 + $0x20] sm:$0xff]  ;;  %vm160_vm4 = vcmp.ge.u32.totalorder %v135_v20, 0  ;;  %v86_v24 = vld [vmem:[#allocation5 + $0x28] sm:$0xff]  ;;  %v136_v25 = vld [vmem:[#allocation7 + $0x28] sm:$0xff]  ;;  %p328_p13 = por %p327_p12, %p326_p11 }
  0x3c   :  { %207 = vst [vmem:[#allocation8 + $0x8] sm:$0xff] %v182_v16  ;;  %v183_v21 = vsel %vm158_vm2, %v108_v12, 0.0  ;;  %v110_v22 = vadd.f32 %v85_v19, %v60_v18  ;;  %v61_v23 = vld [vmem:[#allocation2 + $0x28] sm:$0xff]  ;;  %v184_v26 = vsel %vm159_vm3, %v109_v17, 0.0  ;;  %vm161_vm5 = vcmp.ge.u32.totalorder %v136_v25, 0  ;;  %v62_v28 = vld [vmem:[#allocation2 + $0x30] sm:$0xff] }
  0x3d   :  { %208 = vst [vmem:[#allocation8 + $0x10] sm:$0xff] %v183_v21  ;;  %v111_v27 = vadd.f32 %v86_v24, %v61_v23  ;;  %v87_v29 = vld [vmem:[#allocation5 + $0x30] sm:$0xff]  ;;  %v137_v30 = vld [vmem:[#allocation7 + $0x30] sm:$0xff]  ;;  %209 = vst [vmem:[#allocation8 + $0x18] sm:$0xff] %v184_v26  ;;  %p329_p0 = pnand %p328_p13, %p322_p10 }
  0x3e   :  { %v185_v31 = vsel %vm160_vm4, %v110_v22, 0.0  ;;  %v112_v32 = vadd.f32 %v87_v29, %v62_v28  ;;  %vm162_vm6 = vcmp.ge.u32.totalorder %v137_v30, 0  ;;  %v63_v33 = vld [vmem:[#allocation2 + $0x38] sm:$0xff]  ;;  %v88_v34 = vld [vmem:[#allocation5 + $0x38] sm:$0xff]  ;;  %v138_v35 = vld [vmem:[#allocation7 + $0x38] sm:$0xff] }
  0x3f   :  { %210 = vst [vmem:[#allocation8 + $0x20] sm:$0xff] %v185_v31  ;;  %v186_v36 = vsel %vm161_vm5, %v111_v27, 0.0  ;;  %v113_v37 = vadd.f32 %v88_v34, %v63_v33  ;;  %vm163_vm7 = vcmp.ge.u32.totalorder %v138_v35, 0  ;;  %v64_v38 = vld [vmem:[#allocation2 + $0x40] sm:$0xff]  ;;  %v89_v39 = vld [vmem:[#allocation5 + $0x40] sm:$0xff]  ;;  %v139_v40 = vld [vmem:[#allocation7 + $0x40] sm:$0xff] }
  0x40   :  { %211 = vst [vmem:[#allocation8 + $0x28] sm:$0xff] %v186_v36  ;;  %v187_v41 = vsel %vm162_vm6, %v112_v32, 0.0  ;;  %v114_v42 = vadd.f32 %v89_v39, %v64_v38  ;;  %vm164_vm8 = vcmp.ge.u32.totalorder %v139_v40, 0  ;;  %v65_v43 = vld [vmem:[#allocation2 + $0x48] sm:$0xff]  ;;  %v90_v44 = vld [vmem:[#allocation5 + $0x48] sm:$0xff]  ;;  %v140_v45 = vld [vmem:[#allocation7 + $0x48] sm:$0xff] }
  0x41   :  { %212 = vst [vmem:[#allocation8 + $0x30] sm:$0xff] %v187_v41  ;;  %v188_v46 = vsel %vm163_vm7, %v113_v37, 0.0  ;;  %v115_v47 = vadd.f32 %v90_v44, %v65_v43  ;;  %vm165_vm9 = vcmp.ge.u32.totalorder %v140_v45, 0  ;;  %v66_v48 = vld [vmem:[#allocation2 + $0x50] sm:$0xff]  ;;  %v91_v49 = vld [vmem:[#allocation5 + $0x50] sm:$0xff]  ;;  %v141_v50 = vld [vmem:[#allocation7 + $0x50] sm:$0xff] }
  0x42   :  { %213 = vst [vmem:[#allocation8 + $0x38] sm:$0xff] %v188_v46  ;;  %v189_v51 = vsel %vm164_vm8, %v114_v42, 0.0  ;;  %v116_v52 = vadd.f32 %v91_v49, %v66_v48  ;;  %vm166_vm10 = vcmp.ge.u32.totalorder %v141_v50, 0  ;;  %v67_v53 = vld [vmem:[#allocation2 + $0x58] sm:$0xff]  ;;  %v92_v54 = vld [vmem:[#allocation5 + $0x58] sm:$0xff]  ;;  %v142_v55 = vld [vmem:[#allocation7 + $0x58] sm:$0xff] }
  0x43   :  { %214 = vst [vmem:[#allocation8 + $0x40] sm:$0xff] %v189_v51  ;;  %v190_v56 = vsel %vm165_vm9, %v115_v47, 0.0  ;;  %v117_v57 = vadd.f32 %v92_v54, %v67_v53  ;;  %vm167_vm11 = vcmp.ge.u32.totalorder %v142_v55, 0  ;;  %v68_v58 = vld [vmem:[#allocation2 + $0x60] sm:$0xff]  ;;  %v93_v59 = vld [vmem:[#allocation5 + $0x60] sm:$0xff]  ;;  %v143_v60 = vld [vmem:[#allocation7 + $0x60] sm:$0xff] }
  0x44   :  { %215 = vst [vmem:[#allocation8 + $0x48] sm:$0xff] %v190_v56  ;;  %v191_v61 = vsel %vm166_vm10, %v116_v52, 0.0  ;;  %v118_v62 = vadd.f32 %v93_v59, %v68_v58  ;;  %vm168_vm12 = vcmp.ge.u32.totalorder %v143_v60, 0  ;;  %v69_v63 = vld [vmem:[#allocation2 + $0x68] sm:$0xff]  ;;  %v94_v0 = vld [vmem:[#allocation5 + $0x68] sm:$0xff]  ;;  %v144_v1 = vld [vmem:[#allocation7 + $0x68] sm:$0xff] }
  0x45   :  { %216 = vst [vmem:[#allocation8 + $0x50] sm:$0xff] %v191_v61  ;;  %v192_v2 = vsel %vm167_vm11, %v117_v57, 0.0  ;;  %v119_v3 = vadd.f32 %v94_v0, %v69_v63  ;;  %vm169_vm13 = vcmp.ge.u32.totalorder %v144_v1, 0  ;;  %v70_v4 = vld [vmem:[#allocation2 + $0x70] sm:$0xff]  ;;  %v95_v5 = vld [vmem:[#allocation5 + $0x70] sm:$0xff]  ;;  %v145_v6 = vld [vmem:[#allocation7 + $0x70] sm:$0xff] }
  0x46   :  { %217 = vst [vmem:[#allocation8 + $0x58] sm:$0xff] %v192_v2  ;;  %v193_v7 = vsel %vm168_vm12, %v118_v62, 0.0  ;;  %v120_v8 = vadd.f32 %v95_v5, %v70_v4  ;;  %vm170_vm14 = vcmp.ge.u32.totalorder %v145_v6, 0  ;;  %v71_v9 = vld [vmem:[#allocation2 + $0x78] sm:$0xff]  ;;  %v96_v10 = vld [vmem:[#allocation5 + $0x78] sm:$0xff]  ;;  %v146_v11 = vld [vmem:[#allocation7 + $0x78] sm:$0xff] }
  0x47   :  { %218 = vst [vmem:[#allocation8 + $0x60] sm:$0xff] %v193_v7  ;;  %v194_v12 = vsel %vm169_vm13, %v119_v3, 0.0  ;;  %v121_v13 = vadd.f32 %v96_v10, %v71_v9  ;;  %vm171_vm15 = vcmp.ge.u32.totalorder %v146_v11, 0  ;;  %v72_v14 = vld [vmem:[#allocation2 + $0x80] sm:$0xff]  ;;  %v97_v15 = vld [vmem:[#allocation5 + $0x80] sm:$0xff]  ;;  %v147_v16 = vld [vmem:[#allocation7 + $0x80] sm:$0xff] }
  0x48   :  { %219 = vst [vmem:[#allocation8 + $0x68] sm:$0xff] %v194_v12  ;;  %v195_v17 = vsel %vm170_vm14, %v120_v8, 0.0  ;;  %v122_v18 = vadd.f32 %v97_v15, %v72_v14  ;;  %vm172_vm0 = vcmp.ge.u32.totalorder %v147_v16, 0  ;;  %v73_v19 = vld [vmem:[#allocation2 + $0x88] sm:$0xff]  ;;  %v98_v20 = vld [vmem:[#allocation5 + $0x88] sm:$0xff]  ;;  %v148_v21 = vld [vmem:[#allocation7 + $0x88] sm:$0xff] }
  0x49   :  { %220 = vst [vmem:[#allocation8 + $0x70] sm:$0xff] %v195_v17  ;;  %v196_v22 = vsel %vm171_vm15, %v121_v13, 0.0  ;;  %v123_v23 = vadd.f32 %v98_v20, %v73_v19  ;;  %vm173_vm1 = vcmp.ge.u32.totalorder %v148_v21, 0  ;;  %v74_v24 = vld [vmem:[#allocation2 + $0x90] sm:$0xff]  ;;  %v99_v25 = vld [vmem:[#allocation5 + $0x90] sm:$0xff]  ;;  %v149_v26 = vld [vmem:[#allocation7 + $0x90] sm:$0xff] }
  0x4a   :  { %221 = vst [vmem:[#allocation8 + $0x78] sm:$0xff] %v196_v22  ;;  %v197_v27 = vsel %vm172_vm0, %v122_v18, 0.0  ;;  %v124_v28 = vadd.f32 %v99_v25, %v74_v24  ;;  %vm174_vm2 = vcmp.ge.u32.totalorder %v149_v26, 0  ;;  %v75_v29 = vld [vmem:[#allocation2 + $0x98] sm:$0xff]  ;;  %v100_v30 = vld [vmem:[#allocation5 + $0x98] sm:$0xff]  ;;  %v150_v31 = vld [vmem:[#allocation7 + $0x98] sm:$0xff] }
  0x4b   :  { %222 = vst [vmem:[#allocation8 + $0x80] sm:$0xff] %v197_v27  ;;  %v198_v32 = vsel %vm173_vm1, %v123_v23, 0.0  ;;  %v125_v33 = vadd.f32 %v100_v30, %v75_v29  ;;  %vm175_vm3 = vcmp.ge.u32.totalorder %v150_v31, 0  ;;  %v76_v34 = vld [vmem:[#allocation2 + $0xa0] sm:$0xff]  ;;  %v101_v35 = vld [vmem:[#allocation5 + $0xa0] sm:$0xff]  ;;  %v151_v36 = vld [vmem:[#allocation7 + $0xa0] sm:$0xff] }
  0x4c   :  { %223 = vst [vmem:[#allocation8 + $0x88] sm:$0xff] %v198_v32  ;;  %v199_v37 = vsel %vm174_vm2, %v124_v28, 0.0  ;;  %v126_v38 = vadd.f32 %v101_v35, %v76_v34  ;;  %vm176_vm4 = vcmp.ge.u32.totalorder %v151_v36, 0  ;;  %v77_v39 = vld [vmem:[#allocation2 + $0xa8] sm:$0xff]  ;;  %v102_v40 = vld [vmem:[#allocation5 + $0xa8] sm:$0xff]  ;;  %v152_v41 = vld [vmem:[#allocation7 + $0xa8] sm:$0xff] }
  0x4d   :  { %224 = vst [vmem:[#allocation8 + $0x90] sm:$0xff] %v199_v37  ;;  %v200_v42 = vsel %vm175_vm3, %v125_v33, 0.0  ;;  %v127_v43 = vadd.f32 %v102_v40, %v77_v39  ;;  %vm177_vm5 = vcmp.ge.u32.totalorder %v152_v41, 0  ;;  %v78_v44 = vld [vmem:[#allocation2 + $0xb0] sm:$0xff]  ;;  %v103_v45 = vld [vmem:[#allocation5 + $0xb0] sm:$0xff]  ;;  %v153_v46 = vld [vmem:[#allocation7 + $0xb0] sm:$0xff] }
  0x4e   :  { %225 = vst [vmem:[#allocation8 + $0x98] sm:$0xff] %v200_v42  ;;  %v201_v47 = vsel %vm176_vm4, %v126_v38, 0.0  ;;  %v128_v48 = vadd.f32 %v103_v45, %v78_v44  ;;  %vm178_vm6 = vcmp.ge.u32.totalorder %v153_v46, 0  ;;  %v79_v49 = vld [vmem:[#allocation2 + $0xb8] sm:$0xff]  ;;  %v104_v50 = vld [vmem:[#allocation5 + $0xb8] sm:$0xff]  ;;  %v154_v51 = vld [vmem:[#allocation7 + $0xb8] sm:$0xff] }
  0x4f   :  { %226 = vst [vmem:[#allocation8 + $0xa0] sm:$0xff] %v201_v47  ;;  %v202_v52 = vsel %vm177_vm5, %v127_v43, 0.0  ;;  %v129_v53 = vadd.f32 %v104_v50, %v79_v49  ;;  %vm179_vm7 = vcmp.ge.u32.totalorder %v154_v51, 0  ;;  %v80_v54 = vld [vmem:[#allocation2 + $0xc0] sm:$0xff]  ;;  %v105_v55 = vld [vmem:[#allocation5 + $0xc0] sm:$0xff]  ;;  %v155_v56 = vld [vmem:[#allocation7 + $0xc0] sm:$0xff] }
  0x50   :  { %227 = vst [vmem:[#allocation8 + $0xa8] sm:$0xff] %v202_v52  ;;  %v203_v57 = vsel %vm178_vm6, %v128_v48, 0.0  ;;  %v130_v58 = vadd.f32 %v105_v55, %v80_v54  ;;  %vm180_vm8 = vcmp.ge.u32.totalorder %v155_v56, 0 }
  0x51   :  { %228 = vst [vmem:[#allocation8 + $0xb0] sm:$0xff] %v203_v57  ;;  %v204_v59 = vsel %vm179_vm7, %v129_v53, 0.0 }
  0x52   :  { %229 = vst [vmem:[#allocation8 + $0xb8] sm:$0xff] %v204_v59  ;;  %v205_v60 = vsel %vm180_vm8, %v130_v58, 0.0 }
  0x53   :  { %230 = vst [vmem:[#allocation8 + $0xc0] sm:$0xff] %v205_v60 }
  0x54   :  { %332 = shalt.err (!%p329_p0)
}
  0x55   :  { %s333_s27 = scalar_lea.hbm %s445_s3, 3200 }
  0x56   :  { %p334_p1 = scmp.ne.s32.totalorder %s445_s3, %s333_s27  ;;  %p337_p2 = scmp.lt.u32.totalorder %s333_s27, %s445_s3 }
  0x58   :  { %p339_p3 = pnand %p337_p2, %p334_p1 }
  0x5a   :  { %342 = shalt.err (!%p339_p3)
}
  0x5b   :  { %242 = dma.vmem_to_hbm [thread:$0]  %s237_s21, 3200, %s445_s3, [#allocation4], %s351_s24, %s351_s24, %s352_s25  }
  0x5c   :  { %347 = dma.done.wait [#allocation4], 3200  }
  0x5d   :  { %348 = vsyncadd [#allocation4], 4294964096 }
  0x5e   :  { %246 = vsyncpa [#allocation3], 1 }
  0x5f   :  { %247 = vsyncpa [#allocation6], 1 }
  0x60   :  { %248 = vsyncpa [#allocation4], 1 }

</bundles_post_ra>
